<compile_context>
chip_gen: v6e
topology: v6e:2x2x1
jax: 0.10.0
libtpu: 0.0.40
codegen_flags: <defaults>
</compile_context>

<pallas_src>
import jax
import jax.numpy as jnp
from jax import lax
from jax.experimental import pallas as pl
from jax.experimental.pallas import tpu as pltpu


def _make_deriv_loss_kernel(nc, hw, w_img, h_img, t_block):
    def kernel(mask_ref, lr_ref, hr_ref, out_ref, acc_ref):
        i = pl.program_id(0)

        @pl.when(i == 0)
        def _init():
            acc_ref[...] = jnp.zeros_like(acc_ref)

        lr = lr_ref[...].astype(jnp.float32)   # (T, HW)
        hr = hr_ref[...].astype(jnp.float32)   # (T, HW)
        d = hr - lr                            # shared by both derivatives

        # Zero rows belonging to the padded tail block (global row >= nc).
        row = lax.broadcasted_iota(jnp.int32, (t_block, 1), 0)
        valid = (i * t_block + row) < nc
        d = jnp.where(valid, d, jnp.float32(0.0))

        if hw > 1:
            # x-derivative in flattened space; mask kills the wrap terms
            # (positions where col % W == W-1).
            dx = (d[:, 1:] - d[:, :-1]) * mask_ref[:, : hw - 1]
            acc_ref[:, : hw - 1] += jnp.sum(dx * dx, axis=0, keepdims=True)

        if h_img > 1:
            # y-derivative: offset-W difference; every position is valid.
            dy = d[:, w_img:] - d[:, : hw - w_img]
            acc_ref[:, : hw - w_img] += jnp.sum(dy * dy, axis=0, keepdims=True)

        @pl.when(i == pl.num_programs(0) - 1)
        def _finalize():
            out_ref[0] = jnp.sum(acc_ref[...])

    return kernel


def derivative_loss(lr_tensor, hr_tensor, weight=1.0):
    """Pallas TPU implementation of DerivativeLoss.forward.

    lr_tensor, hr_tensor: (N, C, H, W) arrays (same shape). Returns f32 scalar.
    """
    assert lr_tensor.shape == hr_tensor.shape
    bs_img, c_img, h_img, w_img = lr_tensor.shape
    nc = bs_img * c_img
    hw = h_img * w_img

    # Lane-dense layout: (NC, H*W) so the last (lane) dim is packed.
    lr_f = lr_tensor.reshape(nc, hw)
    hr_f = hr_tensor.reshape(nc, hw)

    # Rows per block: ~2 MiB per input block (HBM-bound kernel), multiple of 8
    # so the sublane dim of the BlockSpec tiles cleanly; conservative enough to
    # fit v5e/v6e/v7x VMEM with double-buffering + f32 temporaries.
    itemsize = jnp.dtype(lr_tensor.dtype).itemsize
    row_bytes = hw * itemsize
    target_block_bytes = 2 * 1024 * 1024
    rows = max(1, target_block_bytes // row_bytes)
    if nc <= 8:
        t_block = nc                       # block dim equals full array dim
    else:
        t_block = int(min(rows, nc))
        t_block = max(8, (t_block // 8) * 8)
    num_blocks = pl.cdiv(nc, t_block)

    # {0,1} f32 mask over the flattened x-derivative positions: zero where the
    # adjacent-element diff would cross a row boundary (col % W == W-1).
    col = jnp.arange(hw, dtype=jnp.int32)
    dx_mask = ((col % w_img) != (w_img - 1)).astype(jnp.float32).reshape(1, hw)

    kernel = _make_deriv_loss_kernel(nc, hw, w_img, h_img, t_block)

    n_elem = nc * hw
    cost = pl.CostEstimate(
        flops=10 * n_elem,
        transcendentals=0,
        bytes_accessed=2 * n_elem * itemsize + 4 * hw + 4,
    )

    total = pl.pallas_call(
        kernel,
        out_shape=jax.ShapeDtypeStruct((1,), jnp.float32),
        grid_spec=pltpu.PrefetchScalarGridSpec(
            num_scalar_prefetch=0,
            grid=(num_blocks,),
            in_specs=[
                pl.BlockSpec((1, hw), lambda i: (0, 0)),            # dx mask
                pl.BlockSpec((t_block, hw), lambda i: (i, 0)),      # lr
                pl.BlockSpec((t_block, hw), lambda i: (i, 0)),      # hr
            ],
            out_specs=pl.BlockSpec(memory_space=pltpu.SMEM),
            scratch_shapes=[pltpu.VMEM((1, hw), jnp.float32)],
        ),
        compiler_params=pltpu.CompilerParams(
            dimension_semantics=("arbitrary",),
            vmem_limit_bytes=32 * 1024 * 1024,
        ),
        cost_estimate=cost,
    )(dx_mask, lr_f, hr_f)

    denom = jnp.float32(bs_img * c_img * h_img * w_img)
    return jnp.float32(weight) * total[0] / denom


def _reference(lr, hr, weight=1.0):
    bs, c, h, w = lr.shape
    diff_x_hr = hr[:, :, :, 1:] - hr[:, :, :, :-1]
    diff_x_lr = lr[:, :, :, 1:] - lr[:, :, :, :-1]
    diff_y_hr = hr[:, :, 1:, :] - hr[:, :, :-1, :]
    diff_y_lr = lr[:, :, 1:, :] - lr[:, :, :-1, :]
    diff_x = jnp.sum((diff_x_hr - diff_x_lr) ** 2)
    diff_y = jnp.sum((diff_y_hr - diff_y_lr) ** 2)
    return weight * (diff_x + diff_y) / (bs * c * h * w)


if __name__ == "__main__":
    key = jax.random.PRNGKey(0)
    k1, k2 = jax.random.split(key)
    B, C, H, W = 2, 4, 16, 16
    lr = jax.random.normal(k1, (B, C, H, W), dtype=jnp.float32)
    hr = jax.random.normal(k2, (B, C, H, W), dtype=jnp.float32)

    out = derivative_loss(lr, hr, weight=1.0)
    out = jax.block_until_ready(out)

    ref = _reference(lr, hr, weight=1.0)
    assert jnp.allclose(out, ref, rtol=1e-5, atol=1e-5), (out, ref)

    print("KERNEL_OK")
</pallas_src>

<mosaic_0001>
module attributes {stable_mosaic.version = 11 : i64} {
  func.func @kernel(%arg0: i32, %arg1: memref<1x256xf32, #tpu.memory_space<vmem>>, %arg2: memref<8x256xf32, #tpu.memory_space<vmem>>, %arg3: memref<8x256xf32, #tpu.memory_space<vmem>>, %arg4: memref<1xf32, #tpu.memory_space<smem>>, %arg5: memref<1x256xf32, #tpu.memory_space<vmem>>) attributes {dimension_semantics = [#tpu.dimension_semantics<arbitrary>], iteration_bounds = array<i64: 1>, scalar_prefetch = 0 : i64, scratch_operands = 1 : i64, tpu.core_type = #tpu.core_type<tc>, window_params = [{pipeline_mode = #tpu.pipeline_mode<synchronous>, transform_indices = @transform_0, window_bounds = array<i64: 1, 256>}, {transform_indices = @transform_1, window_bounds = array<i64: 8, 256>}, {transform_indices = @transform_2, window_bounds = array<i64: 8, 256>}, {transform_indices = @transform_3, window_bounds = array<i64: 1>}]} {
    %c0_i32 = arith.constant 0 : i32
    %0 = arith.cmpi eq, %arg0, %c0_i32 : i32
    %1 = arith.extui %0 : i1 to i32
    %c0_i32_0 = arith.constant 0 : i32
    %2 = arith.cmpi ne, %1, %c0_i32_0 : i32
    scf.if %2 {
      %cst_19 = arith.constant 0.000000e+00 : f32
      %40 = vector.broadcast %cst_19 : f32 to vector<1x256xf32>
      %c0_20 = arith.constant 0 : index
      %c0_21 = arith.constant 0 : index
      %41 = vector.load %arg5[%c0_20, %c0_21] : memref<1x256xf32, #tpu.memory_space<vmem>>, vector<1x256xf32>
      tpu.vector_store %arg5[%c0_20, %c0_21], %40 {strides = array<i32>} : memref<1x256xf32, #tpu.memory_space<vmem>>, vector<1x256xf32>,
    } else {
    }
    %c0 = arith.constant 0 : index
    %c0_1 = arith.constant 0 : index
    %3 = vector.load %arg2[%c0, %c0_1] : memref<8x256xf32, #tpu.memory_space<vmem>>, vector<8x256xf32>
    %c0_2 = arith.constant 0 : index
    %c0_3 = arith.constant 0 : index
    %4 = vector.load %arg3[%c0_2, %c0_3] : memref<8x256xf32, #tpu.memory_space<vmem>>, vector<8x256xf32>
    %5 = arith.subf %4, %3 : vector<8x256xf32>
    %6 = tpu.iota {dimensions = array<i32: 0>} : vector<8x1xi32>
    %c8_i32 = arith.constant 8 : i32
    %7 = arith.muli %arg0, %c8_i32 : i32
    %8 = vector.broadcast %7 : i32 to vector<8x1xi32>
    %9 = arith.addi %8, %6 : vector<8x1xi32>
    %c8_i32_4 = arith.constant 8 : i32
    %10 = vector.broadcast %c8_i32_4 : i32 to vector<8x1xi32>
    %11 = arith.cmpi slt, %9, %10 : vector<8x1xi32>
    %cst = arith.constant 0.000000e+00 : f32
    %12 = vector.shape_cast %11 : vector<8x1xi1> to vector<8x1xi1>
    %13 = vector.broadcast %12 : vector<8x1xi1> to vector<8x256xi1>
    %14 = vector.broadcast %cst : f32 to vector<8x256xf32>
    %15 = arith.select %13, %5, %14 : vector<8x256xi1>, vector<8x256xf32>
    %16 = vector.extract_strided_slice %15 {offsets = [0, 1], sizes = [8, 255], strides = [1, 1]} : vector<8x256xf32> to vector<8x255xf32>
    %17 = vector.extract_strided_slice %15 {offsets = [0, 0], sizes = [8, 255], strides = [1, 1]} : vector<8x256xf32> to vector<8x255xf32>
    %18 = arith.subf %16, %17 : vector<8x255xf32>
    %c0_5 = arith.constant 0 : index
    %c0_6 = arith.constant 0 : index
    %19 = vector.load %arg1[%c0_5, %c0_6] : memref<1x256xf32, #tpu.memory_space<vmem>>, vector<1x255xf32>
    %20 = vector.broadcast %19 : vector<1x255xf32> to vector<8x255xf32>
    %21 = arith.mulf %18, %20 : vector<8x255xf32>
    %c0_7 = arith.constant 0 : index
    %c0_8 = arith.constant 0 : index
    %22 = vector.load %arg5[%c0_7, %c0_8] : memref<1x256xf32, #tpu.memory_space<vmem>>, vector<1x255xf32>
    %23 = arith.mulf %21, %21 : vector<8x255xf32>
    %cst_9 = arith.constant dense<0.000000e+00> : vector<255xf32>
    %24 = vector.multi_reduction <add>, %23, %cst_9 [0] : vector<8x255xf32> to vector<255xf32>
    %25 = vector.shape_cast %24 : vector<255xf32> to vector<1x255xf32>
    %26 = arith.addf %22, %25 : vector<1x255xf32>
    %c0_10 = arith.constant 0 : index
    %c0_11 = arith.constant 0 : index
    %27 = vector.load %arg5[%c0_10, %c0_11] : memref<1x256xf32, #tpu.memory_space<vmem>>, vector<1x255xf32>
    tpu.vector_store %arg5[%c0_10, %c0_11], %26 {strides = array<i32>} : memref<1x256xf32, #tpu.memory_space<vmem>>, vector<1x255xf32>,
    %28 = vector.extract_strided_slice %15 {offsets = [0, 16], sizes = [8, 240], strides = [1, 1]} : vector<8x256xf32> to vector<8x240xf32>
    %29 = vector.extract_strided_slice %15 {offsets = [0, 0], sizes = [8, 240], strides = [1, 1]} : vector<8x256xf32> to vector<8x240xf32>
    %30 = arith.subf %28, %29 : vector<8x240xf32>
    %c0_12 = arith.constant 0 : index
    %c0_13 = arith.constant 0 : index
    %31 = vector.load %arg5[%c0_12, %c0_13] : memref<1x256xf32, #tpu.memory_space<vmem>>, vector<1x240xf32>
    %32 = arith.mulf %30, %30 : vector<8x240xf32>
    %cst_14 = arith.constant dense<0.000000e+00> : vector<240xf32>
    %33 = vector.multi_reduction <add>, %32, %cst_14 [0] : vector<8x240xf32> to vector<240xf32>
    %34 = vector.shape_cast %33 : vector<240xf32> to vector<1x240xf32>
    %35 = arith.addf %31, %34 : vector<1x240xf32>
    %c0_15 = arith.constant 0 : index
    %c0_16 = arith.constant 0 : index
    %36 = vector.load %arg5[%c0_15, %c0_16] : memref<1x256xf32, #tpu.memory_space<vmem>>, vector<1x240xf32>
    tpu.vector_store %arg5[%c0_15, %c0_16], %35 {strides = array<i32>} : memref<1x256xf32, #tpu.memory_space<vmem>>, vector<1x240xf32>,
    %c0_i32_17 = arith.constant 0 : i32
    %37 = arith.cmpi eq, %arg0, %c0_i32_17 : i32
    %38 = arith.extui %37 : i1 to i32
    %c0_i32_18 = arith.constant 0 : i32
    %39 = arith.cmpi ne, %38, %c0_i32_18 : i32
    scf.if %39 {
      %c0_19 = arith.constant 0 : index
      %c0_20 = arith.constant 0 : index
      %40 = vector.load %arg5[%c0_19, %c0_20] : memref<1x256xf32, #tpu.memory_space<vmem>>, vector<1x256xf32>
      %41 = vector.shape_cast %40 : vector<1x256xf32> to vector<1x1x256xf32>
      %cst_21 = arith.constant dense<0.000000e+00> : vector<1xf32>
      %42 = vector.multi_reduction <add>, %41, %cst_21 [1, 2] : vector<1x1x256xf32> to vector<1xf32>
      %43 = vector.shape_cast %42 : vector<1xf32> to vector<1x1x1xf32>
      %44 = vector.extract %43[0, 0, 0] : f32 from vector<1x1x1xf32>
      %c0_22 = arith.constant 0 : index
      %45 = memref.load %arg4[%c0_22] : memref<1xf32, #tpu.memory_space<smem>>
      memref.store %44, %arg4[%c0_22] : memref<1xf32, #tpu.memory_space<smem>>
    } else {
    }
    return
  }
  func.func @transform_0(%arg0: i32) -> (i32, i32) {
    %c0_i32 = arith.constant 0 : i32
    %c0_i32_0 = arith.constant 0 : i32
    %c0_i32_1 = arith.constant 0 : i32
    return %c0_i32, %c0_i32_0 : i32, i32
  }
  func.func @transform_1(%arg0: i32) -> (i32, i32) {
    %c0_i32 = arith.constant 0 : i32
    %c0_i32_0 = arith.constant 0 : i32
    return %arg0, %c0_i32 : i32, i32
  }
  func.func @transform_2(%arg0: i32) -> (i32, i32) {
    %c0_i32 = arith.constant 0 : i32
    %c0_i32_0 = arith.constant 0 : i32
    return %arg0, %c0_i32 : i32, i32
  }
  func.func @transform_3(%arg0: i32) -> i32 {
    %c0_i32 = arith.constant 0 : i32
    %c0_i32_0 = arith.constant 0 : i32
    return %c0_i32 : i32
  }
}

</mosaic_0001>

<bundles_post_ra>
// kernel: tpu_custom_call.1
= control target key start
LH: loop header
LB: loop body
LE: loop exit
PB: predicated region body
PF: predicated region fallthrough
CT: control target
= control target key end

     0   :  { %8 = vsyncpa [#allocation4], 0  ;;  %s396_s0 = inlined_call_operand.hbm [shape: f32[1,256], index: 0, kind: input, shape index: {}]   ;;  %s397_s1 = inlined_call_operand.hbm [shape: f32[8,256], index: 1, kind: input, shape index: {}]   ;;  %s398_s2 = inlined_call_operand.hbm [shape: f32[8,256], index: 2, kind: input, shape index: {}]   ;;  %s399_s3 = inlined_call_operand.hbm [shape: f32[1], index: 3, kind: output, shape index: {}]  }
   0x1   :  { %9 = vsyncpa [#allocation7], 0 }
   0x2   :  { %10 = vsyncpa [#allocation5], 0  ;;  %s337_s12 = smov [#allocation6]   ;;  %s338_s14 = smov [#allocation3]  }
   0x3   :  { %s27_s13 = sshll.u32 %s337_s12, 4  ;;  %s17_s15 = sshll.u32 %s338_s14, 4  ;;  %s28_s13 = int_to_ptr.vmem [resolvable:$true] %s27_s13  ;;  %s18_s15 = int_to_ptr.vmem [resolvable:$true] %s17_s15 }
   0x4   :  { %s271_s16 = scalar_lea.vmem %s28_s13, 256  ;;  %p276_p1 = scmp.lt.s32.totalorder %s28_s13, %s28_s13 }
   0x5   :  { %p272_p0 = scmp.ne.s32.totalorder %s28_s13, %s271_s16  ;;  %p277_p2 = scmp.lt.s32.totalorder %s271_s16, %s271_s16 }
   0x7   :  { %p278_p3 = por %p277_p2, %p276_p1 }
   0x9   :  { %p279_p4 = pnand %p278_p3, %p272_p0 }
   0xb   :  { %282 = shalt.err (!%p279_p4)
}
   0xc   :  { %30 = dma.hbm_to_vmem [thread:$0]  %s397_s1, 256, %s28_s13, [#allocation7]  }
   0xd   :  { %s291_s19 = scalar_lea.vmem %s18_s15, 32  ;;  %p296_p6 = scmp.lt.s32.totalorder %s18_s15, %s18_s15 }
   0xe   :  { %p292_p5 = scmp.ne.s32.totalorder %s18_s15, %s291_s19  ;;  %p297_p7 = scmp.lt.s32.totalorder %s291_s19, %s291_s19 }
  0x10   :  { %p298_p8 = por %p297_p7, %p296_p6 }
  0x12   :  { %p299_p9 = pnand %p298_p8, %p292_p5 }
  0x14   :  { %302 = shalt.err (!%p299_p9)
}
  0x15   :  { %20 = dma.hbm_to_vmem [thread:$0]  %s396_s0, 32, %s18_s15, [#allocation4]  }
  0x16   :  { %s339_s22 = smov [#allocation8]  }
  0x17   :  { %s37_s23 = sshll.u32 %s339_s22, 4  ;;  %s38_s23 = int_to_ptr.vmem [resolvable:$true] %s37_s23 }
  0x18   :  { %s311_s24 = scalar_lea.vmem %s38_s23, 256  ;;  %p316_p11 = scmp.lt.s32.totalorder %s38_s23, %s38_s23 }
  0x19   :  { %p312_p10 = scmp.ne.s32.totalorder %s38_s23, %s311_s24  ;;  %p317_p12 = scmp.lt.s32.totalorder %s311_s24, %s311_s24 }
  0x1b   :  { %p318_p13 = por %p317_p12, %p316_p11 }
  0x1d   :  { %p319_p0 = pnand %p318_p13, %p312_p10 }
  0x1f   :  { %322 = shalt.err (!%p319_p0)
}
  0x20   :  { %40 = dma.hbm_to_vmem [thread:$0]  %s398_s2, 256, %s38_s23, [#allocation7]  }
  0x21   :  { %331 = dma.done.wait [#allocation4], 32  }
  0x22   :  { %332 = vsyncadd [#allocation4], 4294967264 }
  0x23   :  { %333 = dma.done.wait [#allocation7], 512  }
  0x24   :  { %334 = vsyncadd [#allocation7], 4294966784  ;;  %v54_v0 = vlaneseq  ;;  %v87_v4 = vld [vmem:[#allocation3] sm:$0x3]  ;;  %v59_v5 = vld [vmem:[#allocation6] sm:$0xff]  ;;  %s340_s0 = smov 1  }
  0x25   :  { %v61_v6 = vld [vmem:[#allocation8] sm:$0xff]  ;;  %v60_v9 = vld [vmem:[#allocation6 + $0x8] sm:$0xff]  ;;  %v62_v10 = vld [vmem:[#allocation8 + $0x8] sm:$0xff]  ;;  %s341_s2 = smov 16   ;;  %v342_v13 = vmov 0.0   ;;  %vm81_vm1 = vcmask 7168  }
  0x26   :  { %v377_v1 = vshrl.u32 %v54_v0, 7  ;;  %v63_v8 = vsub.f32 %v61_v6, %v59_v5  ;;  %v64_v12 = vsub.f32 %v62_v10, %v60_v9  ;;  %vm56_vm0 = vcmp.lt.s32.totalorder %v54_v0, 256  ;;  %s344_s26 = smov 127   ;;  %s345_s27 = smov 112  }
  0x27   :  { %58 = vst.msk [vmem:[#allocation2] sm:$0x3] %vm56_vm0, %v342_v13  ;;  %vm109_vm2 = vcmask 1047560   ;;  %vm156_vm3 = vcmask 130048   ;;  %vm165_vm4 = vcmask 1047680   ;;  %vm143_vm5 = vcmask 1039360  }
  0x28   :  { %v91_v2 = vsub.s32 0, %v377_v1  ;;  %v95_v3 = vsub.s32 1, %v377_v1  ;;  %77 = vrot.lane.b32.xlu0 %v63_v8, %s340_s0  ;;  %v343_v39 = vmov 1966171168   ;;  %vm149_vm6 = vcmp.lt.s32.totalorder %v54_v0, 255  ;;  %s346_s29 = smov [#allocation9]  }
  0x29   :  { %v127_v40 = vunpack.c.l.s4 %v343_v39  ;;  %vm199_vm7 = vcmask 916480   ;;  %vm203_vm8 = vcmp.lt.s32.totalorder %v54_v0, 240  ;;  %vm221_vm9 = vcmask 1040384  }
  0x2a   :  { %v92_v7 = vrot.slane %v87_v4, %v91_v2  ;;  %v96_v11 = vrot.slane %v87_v4, %v95_v3 }
  0x2b   :  { %v128_v48 = vunpack.c.0.s8 %v127_v40 }
  0x2c   :  { %97 = vrot.lane.b32.xlu1 %v92_v7, %s340_s0  ;;  %79 = vrot.lane.b32.xlu0 %v64_v12, %s340_s0 }
  0x2d   :  { %v131_v56 = vsub.s32 %v128_v48, %v377_v1 }
  0x2e   :  { %v106_v10 = vld [vmem:[#allocation2] sm:$0x3] }
  0x30   :  { %99 = vrot.lane.b32.xlu1 %v96_v11, %s340_s0  ;;  %152 = vrot.lane.b32.xlu0 %v63_v8, %s341_s2 }
  0x34   :  { %154 = vrot.lane.b32.xlu1 %v64_v12, %s341_s2 }
  0x9a   :  { %v78_v15 = vpop.permute.xlu0 %77 }
  0x9b   :  { %v85_v16 = vsub.f32 %v63_v8, %v78_v15 }
  0x9e   :  { %v98_v14 = vpop.permute.xlu1 %97  ;;  %v80_v19 = vpop.permute.xlu0 %79 }
  0x9f   :  { %v104_v17 = vmul.f32 %v98_v14, %v85_v16  ;;  %v82_v21 = vsel %vm81_vm1, %v78_v15, %v80_v19 }
  0xa0   :  { %v86_v22 = vsub.f32 %v64_v12, %v82_v21 }
  0xa1   :  { %v107_v20 = vmul.f32 %v104_v17, %v104_v17 }
  0xa2   :  { %v100_v18 = vpop.permute.xlu1 %99  ;;  %v153_v28 = vpop.permute.xlu0 %152 }
  0xa3   :  { %v110_v23 = vsel %vm109_vm2, %v107_v20, 0.0  ;;  %v101_v24 = vsel %vm81_vm1, %v98_v14, %v100_v18  ;;  %v160_v30 = vsub.f32 %v63_v8, %v153_v28 }
  0xa4   :  { %v111_v25 = vrot.slane %v110_v23, 4  ;;  %v105_v26 = vmul.f32 %v101_v24, %v86_v22 }
  0xa5   :  { %v163_v34 = vmul.f32 %v160_v30, %v160_v30 }
  0xa6   :  { %v155_v27 = vpop.permute.xlu1 %154  ;;  %v112_v31 = vadd.f32 %v111_v25, %v110_v23  ;;  %v108_v32 = vmul.f32 %v105_v26, %v105_v26 }
  0xa7   :  { %v157_v29 = vsel %vm156_vm3, %v153_v28, %v155_v27  ;;  %v166_v38 = vsel %vm165_vm4, %v163_v34, 0.0 }
  0xa8   :  { %v161_v33 = vsub.f32 %v64_v12, %v157_v29  ;;  %v113_v35 = vrot.slane %v112_v31, 2  ;;  %v117_v36 = vrot.slane %v108_v32, 4  ;;  %v167_v43 = vrot.slane %v166_v38, 4 }
  0xaa   :  { %v164_v37 = vmul.f32 %v161_v33, %v161_v33  ;;  %v114_v41 = vadd.f32 %v113_v35, %v112_v31  ;;  %v118_v42 = vadd.f32 %v117_v36, %v108_v32  ;;  %v168_v46 = vadd.f32 %v167_v43, %v166_v38 }
  0xac   :  { %v173_v44 = vrot.slane %v164_v37, 4  ;;  %v119_v45 = vrot.slane %v118_v42, 2  ;;  %v115_v49 = vrot.slane %v114_v41, 1  ;;  %v169_v51 = vrot.slane %v168_v46, 2 }
  0xae   :  { %v174_v47 = vadd.f32 %v173_v44, %v164_v37  ;;  %v120_v50 = vadd.f32 %v119_v45, %v118_v42  ;;  %v170_v54 = vadd.f32 %v169_v51, %v168_v46  ;;  %v116_v59 = vadd.f32 %v115_v49, %v114_v41 }
  0xb0   :  { %v175_v52 = vrot.slane %v174_v47, 2  ;;  %v121_v53 = vrot.slane %v120_v50, 1  ;;  %v171_v57 = vrot.slane %v170_v54, 1 }
  0xb2   :  { %v176_v55 = vadd.f32 %v175_v52, %v174_v47  ;;  %v122_v60 = vadd.f32 %v121_v53, %v120_v50  ;;  %v172_v61 = vadd.f32 %v171_v57, %v170_v54 }
  0xb4   :  { %v177_v58 = vrot.slane %v176_v55, 1  ;;  %v125_v63 = vcombine.low %v116_v59, %v122_v60 }
  0xb6   :  { %v178_v62 = vadd.f32 %v177_v58, %v176_v55  ;;  %v132_v4 = vrot.slane %v125_v63, %v131_v56 }
  0xb8   :  { %v181_v5 = vcombine.low %v172_v61, %v178_v62  ;;  %v139_v6 = vrot.slane %v132_v4, %v131_v56 }
  0xba   :  { %v188_v7 = vrot.slane %v181_v5, %v131_v56  ;;  %140 = vrot.lane.b32.xlu0 %v139_v6, %s344_s26 }
  0xbc   :  { %v195_v8 = vrot.slane %v188_v7, %v131_v56 }
  0xbe   :  { %196 = vrot.lane.b32.xlu1 %v195_v8, %s345_s27 }
 0x12c   :  { %v141_v9 = vpop.permute.xlu0 %140 }
 0x12d   :  { %v142_v11 = vrot.slane %v141_v9, 1 }
 0x12f   :  { %v144_v12 = vsel %vm143_vm5, %v141_v9, %v142_v11 }
 0x130   :  { %v146_v13 = vadd.f32 %v144_v12, %v106_v10  ;;  %v197_v14 = vpop.permute.xlu1 %196 }
 0x131   :  { %v198_v15 = vrot.slane %v197_v14, 1 }
 0x132   :  { %151 = vst.msk [vmem:[#allocation2] sm:$0x3] %vm149_vm6, %v146_v13 }
 0x133   :  { %v200_v17 = vsel %vm199_vm7, %v197_v14, %v198_v15 }
 0x139   :  { %v162_v16 = vld [vmem:[#allocation2] sm:$0x3] }
 0x13a   :  { %v202_v18 = vadd.f32 %v200_v17, %v162_v16 }
 0x13c   :  { %205 = vst.msk [vmem:[#allocation2] sm:$0x3] %vm203_vm8, %v202_v18 }
 0x143   :  { %v209_v19 = vld [vmem:[#allocation2] sm:$0x3] }
 0x144   :  { %v214_v20 = vrot.slane %v209_v19, %v91_v2  ;;  %v218_v21 = vrot.slane %v209_v19, %v95_v3 }
 0x146   :  { %v222_v22 = vsel %vm221_vm9, %v214_v20, 0.0  ;;  %v223_v23 = vsel %vm221_vm9, %v218_v21, 0.0 }
 0x147   :  { %v224_v24 = vadd.f32 %v223_v23, %v222_v22 }
 0x149   :  { %225 = vadd.xlane.f32.xlu0 %v224_v24 }
 0x1d2   :  { %v226_v25 = vpop.xlane.xlu0 %225 }
 0x1d3   :  { %v227_v26 = vrot.slane %v226_v25, 4 }
 0x1d5   :  { %v228_v27 = vadd.f32 %v227_v26, %v226_v25 }
 0x1d7   :  { %v229_v0 = vrot.slane %v228_v27, 2 }
 0x1d9   :  { %v230_v28 = vadd.f32 %v229_v0, %v228_v27 }
 0x1db   :  { %v231_v29 = vrot.slane %v230_v28, 1 }
 0x1dd   :  { %v232_v30 = vadd.f32 %v231_v29, %v230_v28 }
 0x1df   :  { %251 = vpush %v232_v30 }
 0x210   :  { %s252_s28 = spop %251 }
 0x211   :  { %235 = sst [smem:[#allocation9]] %s252_s28 }
 0x212   :  { %243 = dma.smem_to_hbm %s346_s29, 16, %s399_s3, [#allocation5]  }
 0x213   :  { %335 = dma.done.wait [#allocation5], 16  }
 0x214   :  { %336 = vsyncadd [#allocation5], 4294967280 }
 0x215   :  { %247 = sfence }
 0x216   :  { %248 = vsyncpa [#allocation4], 1 }
 0x217   :  { %249 = vsyncpa [#allocation7], 1 }
 0x218   :  { %250 = vsyncpa [#allocation5], 1 }

</bundles_post_ra>
